<compile_context>
chip_gen: v6e
topology: v6e:2x2x1
jax: 0.10.0
libtpu: 0.0.40
codegen_flags: <defaults>
</compile_context>

<pallas_src>
import functools
import math

import jax
import jax.numpy as jnp
import numpy as np
from jax.experimental import pallas as pl
from jax.experimental.pallas import tpu as pltpu


def _round_up(a, m):
    return -(-a // m) * m


def _timeblock_kernel(x_ref, w_ref, b_ref, o_ref, *, kernel_size, coutp, chunk, fused):
    """One grid step: x (Cin, TN) -> out (Coutp, TN), both lane-dense.

    Lane columns are flattened (node_row, t) positions.  Grid tiles and in-kernel
    chunks both start/end on row boundaries, so every *valid* conv window
    (t < W_out) lives inside its chunk; the wrap-around lanes produced by the
    in-chunk roll only feed t >= W_out positions, which the wrapper slices off.
    """
    tn = x_ref.shape[-1]
    w = w_ref[...]                                   # fused: (3*Coutp, K*Cin) | (K, 3*Coutp, Cin)
    bias = b_ref[...]                                # (3*Coutp, 1) f32
    for ci in range(tn // chunk):                    # static unroll; small trip count
        lo = ci * chunk
        xc = x_ref[:, lo:lo + chunk].astype(jnp.float32)          # (Cin, chunk)
        # K temporal taps via XLU lane rotation of the resident chunk.
        taps = [xc] + [pltpu.roll(xc, shift=chunk - k, axis=1)    # == roll by -k
                       for k in range(1, kernel_size)]
        if fused:
            # Single fused MXU dot for conv1|conv2|conv3 over all K taps.
            xs = jnp.concatenate(taps, axis=0)                    # (K*Cin, chunk)
            acc = jnp.dot(w, xs, preferred_element_type=jnp.float32)
        else:
            # Cin not sublane-aligned: K tiny dots, f32 accumulate.
            acc = jnp.dot(w[0], taps[0], preferred_element_type=jnp.float32)
            for k in range(1, kernel_size):
                acc = acc + jnp.dot(w[k], taps[k], preferred_element_type=jnp.float32)
        acc = acc + bias                                          # (3*Coutp, chunk) f32
        a = acc[:coutp, :]                                        # conv1
        g = acc[coutp:2 * coutp, :]                               # conv2 (gate)
        c = acc[2 * coutp:, :]                                    # conv3 (residual)
        sig_g = 0.5 * (jnp.tanh(0.5 * g) + 1.0)                   # sigmoid via single EUP tanh
        o_ref[:, lo:lo + chunk] = jnp.maximum(a * sig_g + c, 0.0).astype(o_ref.dtype)


def _fuse_weights(params, kernel_size, coutp, fused):
    """torch Conv2d weights (Cout, Cin, 1, K) x3 -> fused layout; biases -> (3*Coutp, 1).

    Cout is zero-padded to Coutp so the in-kernel a/g/c sublane splits are tile-aligned;
    padded channels have zero weight and bias (-> relu(0) = 0, sliced off by the wrapper).
    """
    cout, cin, _, K = params["w1"].shape

    def flat_w(w):                                    # (Cout, Cin, 1, K) -> (Coutp, K, Cin)
        wf = jnp.transpose(w[:, :, 0, :], (0, 2, 1))  # (Cout, K, Cin)
        return jnp.pad(wf, ((0, coutp - cout), (0, 0), (0, 0)))

    def pad_b(b):
        return jnp.pad(b, (0, coutp - cout))

    w3 = jnp.concatenate([flat_w(params["w1"]), flat_w(params["w2"]),
                          flat_w(params["w3"])], axis=0)          # (3*Coutp, K, Cin)
    if fused:
        w_all = w3.reshape(3 * coutp, K * cin)        # column k*Cin + i  <->  w[o, i, 0, k]
    else:
        w_all = jnp.transpose(w3, (1, 0, 2))          # (K, 3*Coutp, Cin)
    b_all = jnp.concatenate([pad_b(params["b1"]), pad_b(params["b2"]),
                             pad_b(params["b3"])]).reshape(-1, 1)
    return w_all.astype(jnp.float32), b_all.astype(jnp.float32)


def _choose_tiling(B, H, W, cin, coutp, kernel_size, in_bytes, out_bytes,
                   target_lanes=2048, chunk_lanes=512, vmem_cap_bytes=20 * 2**20):
    """Rows per grid tile (TR) and rows per in-kernel chunk (CR).

    CR*W and TR*W are multiples of 128 (lane-dense, unmasked stores), TR is a multiple
    of CR, the grid keeps >= 2 steps when the problem allows (v7x: 2 TCs), and the
    double-buffered VMEM footprint stays under vmem_cap_bytes (safe for v7x's
    64 MiB VMEM / 32 MiB scoped default; v5e/v6e have plenty more).
    """
    tr_align = 128 // math.gcd(W, 128)
    h_align = _round_up(H, tr_align)
    # In-kernel chunk: ~chunk_lanes wide so the f32 accumulator stays vreg-resident.
    cr = max(tr_align, (chunk_lanes // W) // tr_align * tr_align)
    cr = min(cr, h_align)
    h_pad = _round_up(H, cr)
    # Grid tile: ~target_lanes wide to amortize per-step pipeline overhead.
    tr = max(cr, (target_lanes // W) // cr * cr)
    if B == 1:
        # Batch axis can't supply >= 2 parallel grid steps: split rows instead.
        tr = min(tr, max(cr, _round_up(-(-H // 2), cr)))
    tr = min(tr, h_pad)

    def vmem_bytes(tr_):
        tn = tr_ * W
        io = 2 * tn * (cin * in_bytes + coutp * out_bytes)          # double-buffered tiles
        live = (kernel_size * cin + 3 * coutp) * (cr * W) * 4       # in-kernel f32 chunk
        return io + live

    while tr > cr and vmem_bytes(tr) > vmem_cap_bytes:
        tr -= cr
    return tr, cr


def timeblock_forward(x_nchw, params, kernel_size=3, *, use_bf16=False,
                      out_dtype=None, target_lanes=2048, chunk_lanes=512):
    """x_nchw: (B, Cin, H=num_nodes, W=num_timesteps) -> (B, Cout, H, W - K + 1)."""
    B, Cin, H, W = x_nchw.shape
    K = kernel_size
    W_out = W - K + 1
    Cout = params["w1"].shape[0]
    Coutp = _round_up(Cout, 8)                       # sublane-aligned a/g/c splits
    out_dtype = x_nchw.dtype if out_dtype is None else out_dtype
    in_dtype = jnp.bfloat16 if use_bf16 else x_nchw.dtype

    fused = (Cin % 8 == 0)                           # aligned sublane stack -> single MXU dot
    w_all, b_all = _fuse_weights(params, K, Coutp, fused)

    TR, CR = _choose_tiling(B, H, W, Cin, Coutp, K,
                            jnp.dtype(in_dtype).itemsize, jnp.dtype(out_dtype).itemsize,
                            target_lanes=target_lanes, chunk_lanes=chunk_lanes)
    Hpad = _round_up(H, TR)
    if Hpad > H:
        x_nchw = jnp.pad(x_nchw, ((0, 0), (0, 0), (0, Hpad - H), (0, 0)))
    # Free layout view: (B, Cin, Hpad*W); time contiguous per node row, no transpose.
    x_view = x_nchw.reshape(B, Cin, Hpad * W)
    if use_bf16:
        x_view = x_view.astype(jnp.bfloat16)         # halves the dominant HBM read

    TN = TR * W
    grid = (B, Hpad // TR)
    kern = functools.partial(_timeblock_kernel, kernel_size=K, coutp=Coutp,
                             chunk=CR * W, fused=fused)
    w_spec = (pl.BlockSpec((3 * Coutp, K * Cin), lambda b, j: (0, 0)) if fused
              else pl.BlockSpec((K, 3 * Coutp, Cin), lambda b, j: (0, 0, 0)))

    out_flat = pl.pallas_call(
        kern,
        out_shape=jax.ShapeDtypeStruct((B, Coutp, Hpad * W), out_dtype),
        grid=grid,
        in_specs=[
            pl.BlockSpec((pl.Squeezed(), Cin, TN), lambda b, j: (b, 0, j)),   # x tile
            w_spec,                                                           # fused weights
            pl.BlockSpec((3 * Coutp, 1), lambda b, j: (0, 0)),                # fused bias
        ],
        out_specs=pl.BlockSpec((pl.Squeezed(), Coutp, TN), lambda b, j: (b, 0, j)),
        compiler_params=pltpu.CompilerParams(
            dimension_semantics=("parallel", "parallel")),
    )(x_view, w_all, b_all)

    # Drop channel/row padding and the K-1 invalid time positions per row; no transpose.
    return out_flat.reshape(B, Coutp, Hpad, W)[:, :Cout, :H, :W_out]


def init_timeblock_params(key, in_channels, out_channels, kernel_size=3):
    """PyTorch-style uniform(-1/sqrt(fan_in), 1/sqrt(fan_in)) init, deterministic."""
    fan_in = in_channels * 1 * kernel_size
    bound = 1.0 / np.sqrt(fan_in)
    keys = jax.random.split(key, 6)
    wshape = (out_channels, in_channels, 1, kernel_size)
    return {
        "w1": jax.random.uniform(keys[0], wshape, jnp.float32, -bound, bound),
        "b1": jax.random.uniform(keys[1], (out_channels,), jnp.float32, -bound, bound),
        "w2": jax.random.uniform(keys[2], wshape, jnp.float32, -bound, bound),
        "b2": jax.random.uniform(keys[3], (out_channels,), jnp.float32, -bound, bound),
        "w3": jax.random.uniform(keys[4], wshape, jnp.float32, -bound, bound),
        "b3": jax.random.uniform(keys[5], (out_channels,), jnp.float32, -bound, bound),
    }


def _reference_forward(x, params):
    """Plain-JAX reference replicating the PyTorch forward (valid conv along W)."""
    dn = jax.lax.conv_dimension_numbers(x.shape, params["w1"].shape,
                                        ("NCHW", "OIHW", "NCHW"))

    def conv(w, b):
        y = jax.lax.conv_general_dilated(x, w, (1, 1), "VALID", dimension_numbers=dn)
        return y + b.reshape(1, -1, 1, 1)

    a = conv(params["w1"], params["b1"])
    g = conv(params["w2"], params["b2"])
    c = conv(params["w3"], params["b3"])
    return jnp.maximum(a * jax.nn.sigmoid(g) + c, 0.0)


if __name__ == "__main__":
    key = jax.random.PRNGKey(0)
    k1, k2, k3, k4 = jax.random.split(key, 4)

    # Config 1: tiny Cin (unaligned -> K-dot path), matches the suggested small shapes.
    B, Cin, Cout, K = 2, 4, 8, 3
    num_nodes, num_timesteps = 16, 16           # H, W in NCHW
    x = jax.random.normal(k1, (B, Cin, num_nodes, num_timesteps), jnp.float32)
    params = init_timeblock_params(k2, Cin, Cout, K)
    ref = jax.block_until_ready(_reference_forward(x, params))

    out = jax.block_until_ready(timeblock_forward(x, params, kernel_size=K))
    assert out.shape == (B, Cout, num_nodes, num_timesteps - K + 1), out.shape
    np.testing.assert_allclose(np.asarray(out), np.asarray(ref), rtol=1e-5, atol=1e-5)

    # bf16-input path (mem-bound win on v6e/v7x); f32 in-kernel math -> loose tolerance.
    out_bf16 = jax.block_until_ready(
        timeblock_forward(x, params, kernel_size=K, use_bf16=True))
    np.testing.assert_allclose(np.asarray(out_bf16), np.asarray(ref),
                               rtol=3e-2, atol=3e-2)

    # Config 2: sublane-aligned Cin (single fused MXU dot path) + row padding + odd W.
    B2, Cin2, Cout2 = 2, 8, 8
    H2, W2 = 20, 12
    x2 = jax.random.normal(k3, (B2, Cin2, H2, W2), jnp.float32)
    params2 = init_timeblock_params(k4, Cin2, Cout2, K)
    ref2 = jax.block_until_ready(_reference_forward(x2, params2))
    out2 = jax.block_until_ready(timeblock_forward(x2, params2, kernel_size=K))
    assert out2.shape == (B2, Cout2, H2, W2 - K + 1), out2.shape
    np.testing.assert_allclose(np.asarray(out2), np.asarray(ref2), rtol=1e-5, atol=1e-5)

    print("KERNEL_OK")
</pallas_src>

<mosaic_0001>
module attributes {stable_mosaic.version = 11 : i64} {
  func.func @_timeblock_kernel(%arg0: i32, %arg1: i32, %arg2: memref<1x4x256xf32, #tpu.memory_space<vmem>>, %arg3: memref<3x24x4xf32, #tpu.memory_space<vmem>>, %arg4: memref<24x1xf32, #tpu.memory_space<vmem>>, %arg5: memref<1x8x256xf32, #tpu.memory_space<vmem>>) attributes {dimension_semantics = [#tpu.dimension_semantics<parallel>, #tpu.dimension_semantics<parallel>], iteration_bounds = array<i64: 2, 1>, scalar_prefetch = 0 : i64, scratch_operands = 0 : i64, tpu.core_type = #tpu.core_type<tc>, window_params = [{transform_indices = @transform_0, window_bounds = array<i64: 1, 4, 256>}, {pipeline_mode = #tpu.pipeline_mode<synchronous>, transform_indices = @transform_1, window_bounds = array<i64: 3, 24, 4>}, {pipeline_mode = #tpu.pipeline_mode<synchronous>, transform_indices = @transform_2, window_bounds = array<i64: 24, 1>}, {transform_indices = @transform_3, window_bounds = array<i64: 1, 8, 256>}]} {
    %c0 = arith.constant 0 : index
    %c0_0 = arith.constant 0 : index
    %c0_1 = arith.constant 0 : index
    %0 = vector.load %arg3[%c0, %c0_0, %c0_1] : memref<3x24x4xf32, #tpu.memory_space<vmem>>, vector<3x24x4xf32>
    %c0_2 = arith.constant 0 : index
    %c0_3 = arith.constant 0 : index
    %1 = vector.load %arg4[%c0_2, %c0_3] : memref<24x1xf32, #tpu.memory_space<vmem>>, vector<24x1xf32>
    %c0_4 = arith.constant 0 : index
    %c0_5 = arith.constant 0 : index
    %c0_6 = arith.constant 0 : index
    %2 = vector.load %arg2[%c0_4, %c0_5, %c0_6] : memref<1x4x256xf32, #tpu.memory_space<vmem>>, vector<1x4x256xf32>
    %3 = vector.shape_cast %2 : vector<1x4x256xf32> to vector<4x256xf32>
    %c255_i32 = arith.constant 255 : i32
    %4 = tpu.dynamic_rotate %3 by %c255_i32 dim 1 : vector<4x256xf32>, i32 -> vector<4x256xf32>
    %c254_i32 = arith.constant 254 : i32
    %5 = tpu.dynamic_rotate %3 by %c254_i32 dim 1 : vector<4x256xf32>, i32 -> vector<4x256xf32>
    %6 = vector.extract_strided_slice %0 {offsets = [0, 0, 0], sizes = [1, 24, 4], strides = [1, 1, 1]} : vector<3x24x4xf32> to vector<1x24x4xf32>
    %7 = vector.shape_cast %6 : vector<1x24x4xf32> to vector<24x4xf32>
    %cst = arith.constant dense<0.000000e+00> : vector<24x256xf32>
    %8 = tpu.matmul %7, %3, %cst {dimension_numbers = #tpu.dot_dimension_numbers<[1], [0], [0], [1], [0, 0, 1, 1], [], []>} : vector<24x4xf32>, vector<4x256xf32>, vector<24x256xf32> -> vector<24x256xf32>
    %9 = vector.extract_strided_slice %0 {offsets = [1, 0, 0], sizes = [1, 24, 4], strides = [1, 1, 1]} : vector<3x24x4xf32> to vector<1x24x4xf32>
    %10 = vector.shape_cast %9 : vector<1x24x4xf32> to vector<24x4xf32>
    %cst_7 = arith.constant dense<0.000000e+00> : vector<24x256xf32>
    %11 = tpu.matmul %10, %4, %cst_7 {dimension_numbers = #tpu.dot_dimension_numbers<[1], [0], [0], [1], [0, 0, 1, 1], [], []>} : vector<24x4xf32>, vector<4x256xf32>, vector<24x256xf32> -> vector<24x256xf32>
    %12 = arith.addf %8, %11 : vector<24x256xf32>
    %13 = vector.extract_strided_slice %0 {offsets = [2, 0, 0], sizes = [1, 24, 4], strides = [1, 1, 1]} : vector<3x24x4xf32> to vector<1x24x4xf32>
    %14 = vector.shape_cast %13 : vector<1x24x4xf32> to vector<24x4xf32>
    %cst_8 = arith.constant dense<0.000000e+00> : vector<24x256xf32>
    %15 = tpu.matmul %14, %5, %cst_8 {dimension_numbers = #tpu.dot_dimension_numbers<[1], [0], [0], [1], [0, 0, 1, 1], [], []>} : vector<24x4xf32>, vector<4x256xf32>, vector<24x256xf32> -> vector<24x256xf32>
    %16 = arith.addf %12, %15 : vector<24x256xf32>
    %17 = vector.broadcast %1 : vector<24x1xf32> to vector<24x256xf32>
    %18 = arith.addf %16, %17 : vector<24x256xf32>
    %19 = vector.extract_strided_slice %18 {offsets = [0, 0], sizes = [8, 256], strides = [1, 1]} : vector<24x256xf32> to vector<8x256xf32>
    %20 = vector.extract_strided_slice %18 {offsets = [8, 0], sizes = [8, 256], strides = [1, 1]} : vector<24x256xf32> to vector<8x256xf32>
    %21 = vector.extract_strided_slice %18 {offsets = [16, 0], sizes = [8, 256], strides = [1, 1]} : vector<24x256xf32> to vector<8x256xf32>
    %cst_9 = arith.constant 5.000000e-01 : f32
    %22 = vector.broadcast %cst_9 : f32 to vector<8x256xf32>
    %23 = arith.mulf %22, %20 : vector<8x256xf32>
    %24 = math.tanh %23 : vector<8x256xf32>
    %cst_10 = arith.constant 1.000000e+00 : f32
    %25 = vector.broadcast %cst_10 : f32 to vector<8x256xf32>
    %26 = arith.addf %24, %25 : vector<8x256xf32>
    %cst_11 = arith.constant 5.000000e-01 : f32
    %27 = vector.broadcast %cst_11 : f32 to vector<8x256xf32>
    %28 = arith.mulf %27, %26 : vector<8x256xf32>
    %29 = arith.mulf %19, %28 : vector<8x256xf32>
    %30 = arith.addf %29, %21 : vector<8x256xf32>
    %cst_12 = arith.constant 0.000000e+00 : f32
    %31 = vector.broadcast %cst_12 : f32 to vector<8x256xf32>
    %32 = arith.maximumf %30, %31 : vector<8x256xf32>
    %c0_13 = arith.constant 0 : index
    %c0_14 = arith.constant 0 : index
    %c0_15 = arith.constant 0 : index
    %33 = vector.load %arg5[%c0_13, %c0_14, %c0_15] : memref<1x8x256xf32, #tpu.memory_space<vmem>>, vector<1x8x256xf32>
    %34 = vector.shape_cast %33 : vector<1x8x256xf32> to vector<8x256xf32>
    %35 = vector.shape_cast %32 : vector<8x256xf32> to vector<1x8x256xf32>
    tpu.vector_store %arg5[%c0_13, %c0_14, %c0_15], %35 {strides = array<i32>} : memref<1x8x256xf32, #tpu.memory_space<vmem>>, vector<1x8x256xf32>,
    return
  }
  func.func @transform_0(%arg0: i32, %arg1: i32) -> (i32, i32, i32) {
    %c0_i32 = arith.constant 0 : i32
    %c0_i32_0 = arith.constant 0 : i32
    return %arg0, %c0_i32, %arg1 : i32, i32, i32
  }
  func.func @transform_1(%arg0: i32, %arg1: i32) -> (i32, i32, i32) {
    %c0_i32 = arith.constant 0 : i32
    %c0_i32_0 = arith.constant 0 : i32
    %c0_i32_1 = arith.constant 0 : i32
    %c0_i32_2 = arith.constant 0 : i32
    return %c0_i32, %c0_i32_0, %c0_i32_1 : i32, i32, i32
  }
  func.func @transform_2(%arg0: i32, %arg1: i32) -> (i32, i32) {
    %c0_i32 = arith.constant 0 : i32
    %c0_i32_0 = arith.constant 0 : i32
    %c0_i32_1 = arith.constant 0 : i32
    return %c0_i32, %c0_i32_0 : i32, i32
  }
  func.func @transform_3(%arg0: i32, %arg1: i32) -> (i32, i32, i32) {
    %c0_i32 = arith.constant 0 : i32
    %c0_i32_0 = arith.constant 0 : i32
    return %arg0, %c0_i32, %arg1 : i32, i32, i32
  }
}

</mosaic_0001>

<bundles_post_ra>
// kernel: tpu_custom_call.1
= control target key start
LH: loop header
LB: loop body
LE: loop exit
PB: predicated region body
PF: predicated region fallthrough
CT: control target
= control target key end

     0   :  { %8 = vsyncpa [#allocation3], 0  ;;  %s1028_s0 = inlined_call_operand.vmem [shape: f32[2,4,256], index: 0, kind: input, shape index: {}]   ;;  %s1029_s1 = inlined_call_operand.vmem [shape: f32[3,24,4], index: 1, kind: input, shape index: {}]   ;;  %s1030_s2 = inlined_call_operand.vmem [shape: f32[24,1], index: 2, kind: input, shape index: {}]   ;;  %s1031_s3 = inlined_call_operand.hbm [shape: f32[2,8,256], index: 3, kind: output, shape index: {}]  }
   0x1   :  { %10 = vsyncpa [#allocation3 + $0x1], 0  ;;  %s863_s12 = smov 0   ;;  %s865_s13 = smov 0  }
   0x2   :  { %s867_s14 = smov 0   ;;  %s869_s15 = smov 0  }
   0x3   :  { %s871_s16 = smov 0   ;;  %s873_s17 = smov 0  }
   0x4 LB: > { %s662_s18 = sadd.s32 4294967295, %s836_s17   ;;  %s663_s19 = sadd.s32 4294967294, %s836_s17   ;;  %s836_s17 = sphi %s873_s17, %s16_s17   ;;  %s832_s16 = sphi %s871_s16, %s1038_s16   ;;  %s828_s15 = sphi %s869_s15, %s1037_s15   ;;  %s824_s14 = sphi %s867_s14, %s1036_s14   ;;  %s820_s13 = sphi %s865_s13, %s1035_s13   ;;  %s816_s12 = sphi %s863_s12, %s1034_s12  }
   0x5   : > { %s28_s20 = sadd.s32 1, %s832_s16  ;;  %s107_s21 = sadd.s32 1, %s824_s14 }
   0x6   : > { %p30_p0 = scmp.ge.s32.totalorder %s28_s20, 2  ;;  %p117_p1 = scmp.ne.s32.totalorder %s824_s14, %s820_s13 }
   0x7   : > { %p118_p2 = scmp.eq.s32.totalorder %s662_s18, 1  ;;  %p123_p3 = scmp.ne.s32.totalorder %s820_s13, %s816_s12 }
   0x8   : > { %s1040_s20 = smov (%p30_p0, %s28_s20), 0  ;;  %p124_p5 = scmp.eq.s32.totalorder %s663_s19, 1 }
   0x9   : > { %p903_p4 = por %p118_p2, %p117_p1  ;;  %s102_s23 = ssub.s32 %s832_s16, %s1040_s20 }
   0xa   : > { %p666_p6 = scmp.ge.s32.totalorder %s836_s17, 1  ;;  %p105_p7 = scmp.eq.s32.totalorder %s102_s23, 0 }
   0xb   : > { %p910_p8 = por %p124_p5, %p123_p3  ;;  %p161_p9 = scmp.lt.s32.totalorder %s836_s17, 3 }
   0xc   : > { %s916_s25 = scalar_select %p105_p7, %s824_s14, %s107_s21  }
   0xd   : > { %p162_p10 = pnand %p666_p6, %p161_p9 }
   0xe   : > { %p190_p11 = scmp.lt.s32.totalorder (!%p162_p10), %s828_s15, 1  ;;  %s839_s4 = smov (!%p162_p10), 127  }
   0xf   : > { %165 = sbr.rel (%p162_p10) target bundleno = 399 (0x18f), region = 32  ;;  %s840_s5 = smov (!%p162_p10), 126  }
  0x10   : > { %s186_s19 = sand.u32 (!%p162_p10), 1, %s820_s13   ;;  %s691_s23 = sshll.u32 (!%p162_p10), %s828_s15, 8 }
  0x11   : > { %s667_s21 = sshll.u32 (!%p162_p10), %s186_s19, 4 }
  0x14   : > { %v838_v0 = vmov 0.0   ;;  %s191_s26 = scalar_select %p190_p11, %s828_s15, 1  ;;  %v209_v3 = vld [vmem:[%s1030_s2] sm:$0xff]  ;;  %v210_v4 = vld [vmem:[%s1030_s2 + $0x8] sm:$0xff]  ;;  %v841_v5 = vmov 0   ;;  %v211_v6 = vld [vmem:[%s1030_s2 + $0x10] sm:$0xff]  ;;  %v220_v7 = vlaneseq }
  0x15   : > { %319 = vmatprep.mubr.f32.mxu1 %v838_v0  ;;  %313 = vmatprep.mubr.f32.mxu0 %v838_v0  ;;  %vm242_vm1 = vcmask 1043456   ;;  %v204_v15 = vld [vmem:[%s1029_s1 + $0x20] sm:$0xff]  ;;  %vm232_vm3 = vcmask 31744   ;;  %v203_v17 = vld [vmem:[%s1029_s1 + $0x18] sm:$0xff]  ;;  %v205_v19 = vld [vmem:[%s1029_s1 + $0x28] sm:$0xff]  ;;  %s842_s15 = smov [#allocation2]  }
  0x16   : > { %s690_s27 = sshll.u32 %s191_s26, 3  ;;  %754 = vset.pattern.permute.xlu1 %v841_v5  ;;  %753 = vset.pattern.permute.xlu0 %v841_v5  ;;  %v221_v8 = vand.u32 127, %v220_v7  ;;  %v206_v20 = vld [vmem:[%s1029_s1 + $0x30] sm:$0xff]  ;;  %v200_v21 = vld [vmem:[%s1029_s1] sm:$0xff]  ;;  %v207_v22 = vld [vmem:[%s1029_s1 + $0x38] sm:$0xff]  ;;  %s188_s26 = scalar_lea.vmem [#allocation2], %s667_s21 }
  0x17   : > { %s197_s30 = scalar_lea.vmem %s1028_s0, %s690_s27  ;;  %v201_v23 = vld [vmem:[%s1029_s1 + $0x8] sm:$0xff]  ;;  %v208_v24 = vld [vmem:[%s1029_s1 + $0x40] sm:$0xff]  ;;  %v202_v25 = vld [vmem:[%s1029_s1 + $0x10] sm:$0xff]  ;;  %s586_s27 = sshll.u32 %s188_s26, 4  ;;  %s587_s27 = int_to_ptr.vmem [resolvable:$true] %s586_s27 }
  0x18   : > { %v212_v1 = vld [vmem:[%s197_s30] sm:$0xff]  ;;  %vm222_vm0 = vcmp.lt.s32.totalorder %v221_v8, 127  ;;  %vm229_vm2 = vcmp.lt.s32.totalorder %v221_v8, 126  ;;  %s584_s30 = scalar_lea.hbm %s1031_s3, %s691_s23  ;;  %s764_s6 = sshll.u32 %s842_s15, 4  ;;  %s765_s6 = int_to_ptr.vmem [resolvable:$false] %s764_s6 }
  0x19   : > { %216 = vrot.lane.b32.xlu0 %v212_v1, %s839_s4  ;;  %225 = vrot.lane.b32.xlu1 %v212_v1, %s840_s5  ;;  %v214_v2 = vcombine.high %v212_v1, %v212_v1  ;;  %s766_s7 = scalar_lea.vmem %s765_s6, 512  ;;  %p767_p1 = scmp.lt.s32.totalorder %s587_s27, %s765_s6 }
  0x1d   : > { %218 = vrot.lane.b32.xlu0 %v214_v2, %s839_s4  ;;  %227 = vrot.lane.b32.xlu1 %v214_v2, %s840_s5  ;;  %s570_s4 = scalar_lea.sflag [#allocation3], %s186_s19  ;;  %s760_s5 = scalar_lea.vmem %s587_s27, 256 }
  0x1e   : > { %p761_p12 = scmp.ne.s32.totalorder %s587_s27, %s760_s5  ;;  %p768_p2 = scmp.lt.s32.totalorder %s766_s7, %s760_s5 }
  0x20   : > { %p762_p13 = pnand %p761_p12, %p903_p4  ;;  %p769_p3 = por %p768_p2, %p767_p1 }
  0x21   : > { %534 = vperm.xlu1 %754, %v209_v3   ;;  %539 = vperm.xlu0 %753, %v210_v4  }
  0x22   : > { %p763_p0 = pneg %p762_p13 }
  0x24   : > { %p770_p5 = pnand %p769_p3, %p763_p0 }
  0x25   : > { %544 = vperm.xlu1 %754, %v211_v6  }
  0x8b   : > { %v217_v9 = vpop.permute.xlu0 %216  ;;  %v226_v10 = vpop.permute.xlu1 %225 }
  0x8f   : > { %v219_v11 = vpop.permute.xlu0 %218  ;;  %v228_v12 = vpop.permute.xlu1 %227 }
  0x90   : > { %v224_v13 = vsel %vm222_vm0, %v219_v11, %v217_v9  ;;  %v223_v14 = vsel %vm222_vm0, %v217_v9, %v219_v11  ;;  %v231_v16 = vsel %vm229_vm2, %v228_v12, %v226_v10  ;;  %v230_v18 = vsel %vm229_vm2, %v226_v10, %v228_v12 }
  0x91   : > { %670 = vmatprep.subr.msk.mxu0 %vm242_vm1, %v224_v13  ;;  %692 = vmatprep.subr.msk.mxu1 %vm242_vm1, %v224_v13 }
  0x92   : > { %671 = vmatpush1.msk.msra.mxu0 %vm242_vm1, %v223_v14  ;;  %693 = vmatpush1.msk.msra.mxu1 %vm242_vm1, %v223_v14 }
  0x93   : > { %673 = vmatmul.mubr.msk.f32.vlgmr.msra.gmra.mxu1 %vm232_vm3, %v204_v15  ;;  %675 = vmatprep.subr.msk.mxu1 %vm242_vm1, %v214_v2 }
  0x94   : > { %676 = vmatpush1.msk.msra.mxu1 %vm242_vm1, %v212_v1  ;;  %680 = vmatprep.subr.msk.mxu0 %vm242_vm1, %v231_v16 }
  0x95   : > { %672 = vmatmul.mubr.msk.f32.vlgmr.msra.gmra.mxu0 %vm232_vm3, %v203_v17  ;;  %325 = vmatprep.mubr.f32.mxu1 %v838_v0 }
  0x96   : > { %681 = vmatpush1.msk.msra.mxu0 %vm242_vm1, %v230_v18  ;;  %507 = vmatprep.mubr.f32.mxu0 %v838_v0 }
  0x97   : > { %674 = vmatmul.mubr.msk.f32.gmra.mxu1 %vm232_vm3, %v205_v19 }
  0x98   : > { %409 = vmatprep.mubr.f32.mxu1 %v838_v0 }
  0x99   : > { %682 = vmatmul.mubr.msk.f32.vlgmr.msra.gmra.mxu0 %vm232_vm3, %v206_v20 }
  0x9a   : > { %513 = vmatprep.mubr.f32.mxu0 %v838_v0 }
  0x9b   : > { %677 = vmatmul.mubr.msk.f32.vlgmr.msra.gmra.mxu1 %vm232_vm3, %v200_v21 }
  0x9c   : > { %415 = vmatprep.mubr.f32.mxu1 %v838_v0  ;;  %v540_v40 = vpop.permute.xlu0 %539  ;;  %v535_v55 = vpop.permute.xlu1 %534 }
  0x9d   : > { %683 = vmatmul.mubr.msk.f32.gmra.mxu0 %vm232_vm3, %v207_v22 }
  0x9e   : > { %519 = vmatprep.mubr.f32.mxu0 %v838_v0 }
  0x9f   : > { %678 = vmatmul.mubr.msk.f32.gmra.mxu1 %vm232_vm3, %v201_v23 }
  0xa0   : > { %421 = vmatprep.mubr.f32.mxu1 %v838_v0  ;;  %v545_v0 = vpop.permute.xlu1 %544 }
  0xa1   : > { %684 = vmatmul.mubr.msk.f32.gmra.mxu0 %vm232_vm3, %v208_v24 }
  0xa3   : > { %679 = vmatmul.mubr.msk.f32.gmra.mxu1 %vm232_vm3, %v202_v25 }
 0x153   : > { %v321_v26 = vpop.f32.mrf.mxu1 }
 0x155   : > { %v323_v27 = vpop.f32.mrf.mxu1  ;;  %v315_v28 = vpop.f32.mrf.mxu0 }
 0x157   : > { %v327_v29 = vpop.f32.mrf.mxu1  ;;  %v317_v30 = vpop.f32.mrf.mxu0 }
 0x159   : > { %v329_v31 = vpop.f32.mrf.mxu1  ;;  %v509_v32 = vpop.f32.mrf.mxu0 }
 0x15b   : > { %v411_v33 = vpop.f32.mrf.mxu1  ;;  %v511_v34 = vpop.f32.mrf.mxu0 }
 0x15c   : > { %v412_v50 = vadd.f32 %v411_v33, %v315_v28 }
 0x15d   : > { %v413_v35 = vpop.f32.mrf.mxu1  ;;  %v515_v37 = vpop.f32.mrf.mxu0 }
 0x15e   : > { %v414_v53 = vadd.f32 %v413_v35, %v317_v30  ;;  %v526_v56 = vadd.f32 %v509_v32, %v412_v50 }
 0x15f   : > { %v417_v36 = vpop.f32.mrf.mxu1  ;;  %v517_v43 = vpop.f32.mrf.mxu0 }
 0x160   : > { %v418_v38 = vadd.f32 %v417_v36, %v321_v26  ;;  %v527_v60 = vadd.f32 %v511_v34, %v414_v53  ;;  %v547_v1 = vadd.f32 %v535_v55, %v526_v56 }
 0x161   : > { %v419_v39 = vpop.f32.mrf.mxu1  ;;  %v521_v52 = vpop.f32.mrf.mxu0 }
 0x162   : > { %v528_v41 = vadd.f32 %v515_v37, %v418_v38  ;;  %v420_v42 = vadd.f32 %v419_v39, %v323_v27  ;;  %v548_v5 = vadd.f32 %v535_v55, %v527_v60 }
 0x163   : > { %v423_v49 = vpop.f32.mrf.mxu1  ;;  %v523_v59 = vpop.f32.mrf.mxu0 }
 0x164   : > { %v529_v44 = vadd.f32 %v517_v43, %v420_v42  ;;  %v549_v45 = vadd.f32 %v540_v40, %v528_v41  ;;  %v424_v54 = vadd.f32 %v423_v49, %v327_v29 }
 0x165   : > { %v425_v51 = vpop.f32.mrf.mxu1 }
 0x166   : > { %v550_v46 = vadd.f32 %v540_v40, %v529_v44  ;;  %v553_v47 = vmul.f32 0.5, %v549_v45  ;;  %v426_v57 = vadd.f32 %v425_v51, %v329_v31  ;;  %v530_v62 = vadd.f32 %v521_v52, %v424_v54 }
 0x168   : > { %v554_v48 = vmul.f32 0.5, %v550_v46  ;;  %756 = vtanh.f32 %v553_v47  ;;  %v531_v4 = vadd.f32 %v523_v59, %v426_v57  ;;  %v551_v7 = vadd.f32 %v545_v0, %v530_v62 }
 0x16a   : > { %758 = vtanh.f32 %v554_v48  ;;  %v552_v10 = vadd.f32 %v545_v0, %v531_v4 }
 0x175   : > { %v757_v58 = vpop.eup %756 }
 0x176   : > { %v557_v61 = vadd.f32 1.0, %v757_v58 }
 0x177   : > { %v759_v63 = vpop.eup %758 }
 0x178   : > { %v558_v2 = vadd.f32 1.0, %v759_v63  ;;  %v559_v3 = vmul.f32 0.5, %v557_v61 }
 0x17a   : > { %v560_v6 = vmul.f32 0.5, %v558_v2  ;;  %v561_v8 = vmul.f32 %v559_v3, %v547_v1 }
 0x17c   : > { %v563_v9 = vadd.f32 %v561_v8, %v551_v7  ;;  %v562_v11 = vmul.f32 %v560_v6, %v548_v5 }
 0x17e   : > { %v565_v12 = vmax.f32 %v563_v9, 0.0  ;;  %v564_v13 = vadd.f32 %v562_v11, %v552_v10 }
 0x180   : > { %567 = vst [vmem:[%s188_s26] sm:$0xff] %v565_v12  ;;  %v566_v14 = vmax.f32 %v564_v13, 0.0 }
 0x182   : > { %568 = vst [vmem:[%s188_s26 + $0x8] sm:$0xff] %v566_v14 }
 0x183   : > { %773 = shalt.err (!%p770_p5)
}
 0x184   : > { %s774_s8 = scalar_lea.hbm %s584_s30, 256  ;;  %s778_s11 = scalar_lea.hbm %s1031_s3, 512 }
 0x185   : > { %p775_p6 = scmp.ne.s32.totalorder %s584_s30, %s774_s8  ;;  %p779_p10 = scmp.lt.s32.totalorder %s584_s30, %s1031_s3 }
 0x186   : > { %p780_p11 = scmp.lt.s32.totalorder %s778_s11, %s774_s8 }
 0x187   : > { %p776_p7 = pnand %p775_p6, %p903_p4 }
 0x188   : > { %p781_p12 = por %p780_p11, %p779_p10 }
 0x189   : > { %p777_p9 = pneg %p776_p7 }
 0x18b   : > { %p782_p13 = pnand %p781_p12, %p777_p9 }
 0x18d   : > { %785 = shalt.err (!%p782_p13)
}
 0x18e   : > { %694 = dma.vmem_to_hbm [thread:$0]  (%p903_p4), %s587_s27, 256, %s584_s30, %s570_s4  }
 0x18f PF: > { %p700_p0 = scmp.ge.s32.totalorder %s836_s17, 2  ;;  %s598_s21 = sand.u32 1, %s816_s12  }
 0x190   : > { %s599_s23 = scalar_lea.sflag [#allocation3], %s598_s21 }
 0x191   : > { %p697_p1 = pnand %p700_p0, %p910_p8 }
 0x193   : > { %p698_p2 = pneg %p697_p1 }
 0x195   : > { %811 = dma.done.wait (%p698_p2), %s599_s23, 256  }
 0x196   : > { %813 = vsyncadd (%p698_p2), %s599_s23, 4294967040  ;;  %s16_s17 = sadd.s32 1, %s836_s17   ;;  %s1034_s12 = smov %s820_s13 }
 0x197   : > { %p13_p3 = scmp.ge.s32.totalorder %s16_s17, 4   ;;  %s1035_s13 = smov %s824_s14 }
 0x198   : > { %s1036_s14 = smov %s916_s25  ;;  %s1037_s15 = smov %s832_s16 }
 0x199   : > { %s1038_s16 = smov %s1040_s20  ;;  %15 = sbr.rel (!%p13_p3) target bundleno = 4 (0x4), region = 67 }
 0x19e   :  { %604 = vsyncpa [#allocation3], 1 }
 0x19f   :  { %606 = vsyncpa [#allocation3 + $0x1], 1 }

</bundles_post_ra>
